<compile_context>
chip_gen: v7x
topology: tpu7x:2x2x1
jax: 0.10.0
libtpu: 0.0.40
codegen_flags: <defaults>
</compile_context>

<pallas_src>
import jax
import jax.numpy as jnp
from jax.experimental import pallas as pl
from jax.experimental.pallas import tpu as pltpu


def residual_kernel(xf_ref, xt_ref, w1_ref, w2_ref, b_ref, o_ref):
    """One batch tile: relu(feat_linear(xf[:, :2]) + text_linear(xt) + b)."""
    # feature_model: Linear(2 -> H).  Rank-2 update on the VPU — two broadcast
    # multiply-adds; leaves the MXU / vector-extended slot for the real matmul.
    xf = xf_ref[...]                                        # (TB, F), F >= 2
    y1 = xf[:, 0:1] * w1_ref[0:1, :] + xf[:, 1:2] * w1_ref[1:2, :]

    # text_model: Linear(Dt -> H) on the MXU with f32 accumulation.
    y2 = jnp.dot(xt_ref[...], w2_ref[...], preferred_element_type=jnp.float32)

    # residual add + pre-folded bias (b1 + b2) + ReLU, all f32.
    o_ref[...] = jnp.maximum(y1 + y2 + b_ref[...], 0.0).astype(o_ref.dtype)


def residual_model(x_feat, x_text, w1, b1, w2, b2, *, tb=512):
    """x_feat: [B, F] (only first 2 cols used), x_text: [B, Dt] -> [B, H]."""
    B, F = x_feat.shape
    Dt = x_text.shape[1]
    H = w1.shape[1]

    # Fold the two biases into one (1, H) operand: one add, one DMA fewer.
    b = (b1 + b2).reshape(1, H).astype(jnp.float32)

    # Batch tile: whole batch if small, else tb rows (multiple of 8).
    tb_eff = B if B <= tb else tb
    grid = (pl.cdiv(B, tb_eff),)

    return pl.pallas_call(
        residual_kernel,
        out_shape=jax.ShapeDtypeStruct((B, H), jnp.float32),
        grid=grid,
        in_specs=[
            # Activations: tiled over the batch axis.
            pl.BlockSpec((tb_eff, F), lambda i: (i, 0)),
            pl.BlockSpec((tb_eff, Dt), lambda i: (i, 0)),
            # Parameters: constant index maps -> VMEM-resident across steps.
            pl.BlockSpec((2, H), lambda i: (0, 0)),
            pl.BlockSpec((Dt, H), lambda i: (0, 0)),
            pl.BlockSpec((1, H), lambda i: (0, 0)),
        ],
        out_specs=pl.BlockSpec((tb_eff, H), lambda i: (i, 0)),
        compiler_params=pltpu.CompilerParams(
            # Batch axis is embarrassingly parallel -> shards across the two
            # TensorCores on v7x; harmless no-op on single-TC v5e/v6e.
            dimension_semantics=("parallel",)),
    )(x_feat, x_text, w1, w2, b)


if __name__ == "__main__":
    key = jax.random.PRNGKey(0)
    k1, k2, k3, k4, k5, k6 = jax.random.split(key, 6)

    B, F, Dt, H = 8, 4, 32, 32

    # deterministic synthetic "batch"
    x_feat = jax.random.normal(k1, (B, F), dtype=jnp.float32)   # batch.feature
    x_text = jax.random.normal(k2, (B, Dt), dtype=jnp.float32)  # batch.text

    # deterministic synthetic parameters for the two sub-models
    w1 = jax.random.normal(k3, (2, H), dtype=jnp.float32) * 0.1   # feature_model
    b1 = jax.random.normal(k4, (H,), dtype=jnp.float32) * 0.1
    w2 = jax.random.normal(k5, (Dt, H), dtype=jnp.float32) * 0.1  # text_model
    b2 = jax.random.normal(k6, (H,), dtype=jnp.float32) * 0.1

    y = residual_model(x_feat, x_text, w1, b1, w2, b2)
    y = jax.block_until_ready(y)

    # reference check in plain JAX
    y_ref = jnp.maximum(
        (x_feat[:, :2] @ w1 + b1) + (x_text @ w2 + b2), 0.0)
    assert y.shape == (B, H)
    assert jnp.allclose(y, y_ref, atol=1e-5, rtol=1e-5)

    print("KERNEL_OK")
</pallas_src>

<mosaic_0001>
module attributes {stable_mosaic.version = 11 : i64} {
  func.func @residual_kernel(%arg0: i32, %arg1: memref<8x4xf32, #tpu.memory_space<vmem>>, %arg2: memref<8x32xf32, #tpu.memory_space<vmem>>, %arg3: memref<2x32xf32, #tpu.memory_space<vmem>>, %arg4: memref<32x32xf32, #tpu.memory_space<vmem>>, %arg5: memref<1x32xf32, #tpu.memory_space<vmem>>, %arg6: memref<8x32xf32, #tpu.memory_space<vmem>>) attributes {dimension_semantics = [#tpu.dimension_semantics<parallel>], iteration_bounds = array<i64: 1>, scalar_prefetch = 0 : i64, scratch_operands = 0 : i64, tpu.core_type = #tpu.core_type<tc>, window_params = [{transform_indices = @transform_0, window_bounds = array<i64: 8, 4>}, {transform_indices = @transform_1, window_bounds = array<i64: 8, 32>}, {pipeline_mode = #tpu.pipeline_mode<synchronous>, transform_indices = @transform_2, window_bounds = array<i64: 2, 32>}, {pipeline_mode = #tpu.pipeline_mode<synchronous>, transform_indices = @transform_3, window_bounds = array<i64: 32, 32>}, {pipeline_mode = #tpu.pipeline_mode<synchronous>, transform_indices = @transform_4, window_bounds = array<i64: 1, 32>}, {transform_indices = @transform_5, window_bounds = array<i64: 8, 32>}]} {
    %c0 = arith.constant 0 : index
    %c0_0 = arith.constant 0 : index
    %0 = vector.load %arg1[%c0, %c0_0] : memref<8x4xf32, #tpu.memory_space<vmem>>, vector<8x4xf32>
    %1 = vector.extract_strided_slice %0 {offsets = [0, 0], sizes = [8, 1], strides = [1, 1]} : vector<8x4xf32> to vector<8x1xf32>
    %c0_1 = arith.constant 0 : index
    %c0_2 = arith.constant 0 : index
    %2 = vector.load %arg3[%c0_1, %c0_2] : memref<2x32xf32, #tpu.memory_space<vmem>>, vector<1x32xf32>
    %3 = vector.broadcast %1 : vector<8x1xf32> to vector<8x32xf32>
    %4 = vector.broadcast %2 : vector<1x32xf32> to vector<8x32xf32>
    %5 = arith.mulf %3, %4 : vector<8x32xf32>
    %6 = vector.extract_strided_slice %0 {offsets = [0, 1], sizes = [8, 1], strides = [1, 1]} : vector<8x4xf32> to vector<8x1xf32>
    %c1 = arith.constant 1 : index
    %c0_3 = arith.constant 0 : index
    %7 = vector.load %arg3[%c1, %c0_3] : memref<2x32xf32, #tpu.memory_space<vmem>>, vector<1x32xf32>
    %8 = vector.broadcast %6 : vector<8x1xf32> to vector<8x32xf32>
    %9 = vector.broadcast %7 : vector<1x32xf32> to vector<8x32xf32>
    %10 = arith.mulf %8, %9 : vector<8x32xf32>
    %11 = arith.addf %5, %10 : vector<8x32xf32>
    %c0_4 = arith.constant 0 : index
    %c0_5 = arith.constant 0 : index
    %12 = vector.load %arg2[%c0_4, %c0_5] : memref<8x32xf32, #tpu.memory_space<vmem>>, vector<8x32xf32>
    %c0_6 = arith.constant 0 : index
    %c0_7 = arith.constant 0 : index
    %13 = vector.load %arg4[%c0_6, %c0_7] : memref<32x32xf32, #tpu.memory_space<vmem>>, vector<32x32xf32>
    %cst = arith.constant dense<0.000000e+00> : vector<8x32xf32>
    %14 = tpu.matmul %12, %13, %cst {dimension_numbers = #tpu.dot_dimension_numbers<[1], [0], [0], [1], [0, 0, 1, 1], [], []>} : vector<8x32xf32>, vector<32x32xf32>, vector<8x32xf32> -> vector<8x32xf32>
    %15 = arith.addf %11, %14 : vector<8x32xf32>
    %c0_8 = arith.constant 0 : index
    %c0_9 = arith.constant 0 : index
    %16 = vector.load %arg5[%c0_8, %c0_9] : memref<1x32xf32, #tpu.memory_space<vmem>>, vector<1x32xf32>
    %17 = vector.broadcast %16 : vector<1x32xf32> to vector<8x32xf32>
    %18 = arith.addf %15, %17 : vector<8x32xf32>
    %cst_10 = arith.constant 0.000000e+00 : f32
    %19 = vector.broadcast %cst_10 : f32 to vector<8x32xf32>
    %20 = arith.maximumf %18, %19 : vector<8x32xf32>
    %c0_11 = arith.constant 0 : index
    %c0_12 = arith.constant 0 : index
    %21 = vector.load %arg6[%c0_11, %c0_12] : memref<8x32xf32, #tpu.memory_space<vmem>>, vector<8x32xf32>
    tpu.vector_store %arg6[%c0_11, %c0_12], %20 {strides = array<i32>} : memref<8x32xf32, #tpu.memory_space<vmem>>, vector<8x32xf32>,
    return
  }
  func.func @transform_0(%arg0: i32) -> (i32, i32) {
    %c0_i32 = arith.constant 0 : i32
    %c0_i32_0 = arith.constant 0 : i32
    return %arg0, %c0_i32 : i32, i32
  }
  func.func @transform_1(%arg0: i32) -> (i32, i32) {
    %c0_i32 = arith.constant 0 : i32
    %c0_i32_0 = arith.constant 0 : i32
    return %arg0, %c0_i32 : i32, i32
  }
  func.func @transform_2(%arg0: i32) -> (i32, i32) {
    %c0_i32 = arith.constant 0 : i32
    %c0_i32_0 = arith.constant 0 : i32
    %c0_i32_1 = arith.constant 0 : i32
    return %c0_i32, %c0_i32_0 : i32, i32
  }
  func.func @transform_3(%arg0: i32) -> (i32, i32) {
    %c0_i32 = arith.constant 0 : i32
    %c0_i32_0 = arith.constant 0 : i32
    %c0_i32_1 = arith.constant 0 : i32
    return %c0_i32, %c0_i32_0 : i32, i32
  }
  func.func @transform_4(%arg0: i32) -> (i32, i32) {
    %c0_i32 = arith.constant 0 : i32
    %c0_i32_0 = arith.constant 0 : i32
    %c0_i32_1 = arith.constant 0 : i32
    return %c0_i32, %c0_i32_0 : i32, i32
  }
  func.func @transform_5(%arg0: i32) -> (i32, i32) {
    %c0_i32 = arith.constant 0 : i32
    %c0_i32_0 = arith.constant 0 : i32
    return %arg0, %c0_i32 : i32, i32
  }
}

</mosaic_0001>

<bundles_post_ra>
// kernel: tpu_custom_call.1
= control target key start
LH: loop header
LB: loop body
LE: loop exit
PB: predicated region body
PF: predicated region fallthrough
CT: control target
= control target key end

     0   :  { %10 = vsyncpa [#allocation3], 0  ;;  %s328_s0 = inlined_call_operand.vmem [shape: f32[8,4], index: 0, kind: input, shape index: {}]   ;;  %s329_s1 = inlined_call_operand.vmem [shape: f32[8,32], index: 1, kind: input, shape index: {}]   ;;  %s330_s2 = inlined_call_operand.vmem [shape: f32[2,32], index: 2, kind: input, shape index: {}]   ;;  %s331_s3 = inlined_call_operand.hbm [shape: f32[32,32], index: 3, kind: input, shape index: {}]   ;;  %s332_s4 = inlined_call_operand.vmem [shape: f32[1,32], index: 4, kind: input, shape index: {}]   ;;  %s333_s5 = inlined_call_operand.hbm [shape: f32[8,32], index: 5, kind: output, shape index: {}]  }
   0x1   :  { %11 = vsyncpa [#allocation4], 0  ;;  %s248_s18 = smov [#allocation2]   ;;  %s200_s22 = scalar_lea.hbm %s331_s3, 512 }
   0x2   :  { %s23_s19 = sshll.u32 %s248_s18, 4  ;;  %p201_p0 = scmp.ne.s32.totalorder %s331_s3, %s200_s22  ;;  %s24_s19 = int_to_ptr.vmem [resolvable:$true] %s23_s19 }
   0x3   :  { %p204_p1 = scmp.lt.u32.totalorder %s200_s22, %s331_s3 }
   0x5   :  { %p206_p2 = pnand %p204_p1, %p201_p0 }
   0x7   :  { %209 = shalt.err (!%p206_p2)
}
   0x8   :  { %s210_s27 = scalar_lea.vmem %s24_s19, 512  ;;  %p215_p4 = scmp.lt.s32.totalorder %s24_s19, %s24_s19 }
   0x9   :  { %p211_p3 = scmp.ne.s32.totalorder %s24_s19, %s210_s27  ;;  %p216_p5 = scmp.lt.s32.totalorder %s210_s27, %s210_s27 }
   0xb   :  { %p217_p6 = por %p216_p5, %p215_p4 }
   0xd   :  { %p218_p7 = pnand %p217_p6, %p211_p3 }
   0xf   :  { %221 = shalt.err (!%p218_p7)
}
  0x10   :  { %s249_s28 = smov 128   ;;  %s250_s29 = smov 8  }
  0x11   :  { %29 = dma.hbm_to_vmem [thread:$0]  %s331_s3, 512, %s24_s19, [#allocation3], %s249_s28, %s249_s28, %s250_s29  }
  0x12   :  { %244 = dma.done.wait [#allocation3], 512  }
  0x13   :  { %245 = vsyncadd [#allocation3], 4294966784  ;;  %v251_v0 = vmov 0.0|0.0   ;;  %vm252_vm0 = vmmov 0   ;;  %v253_v1 = vmov 0.0   ;;  %v254_v2 = vmov 0  }
  0x14   :  { %183 = vmatprep.subr.bf16.mxu0 %v251_v0  ;;  %180 = vmatprep.mubr.msk.f32.mxu0 %vm252_vm0, %v253_v1  ;;  %v59_v3 = vld [vmem:[#allocation2] sm:$0xff]  ;;  %v60_v4 = vld [vmem:[#allocation2 + $0x8] sm:$0xff]  ;;  %v61_v5 = vld [vmem:[#allocation2 + $0x10] sm:$0xff]  ;;  %v255_v10 = vmov 1   ;;  %vm63_vm1 = vcmask 261120   ;;  %s256_s14 = smov [#allocation5]  }
  0x15   :  { %198 = vset.pattern.permute.xlu0 %v254_v2  ;;  %v184_v6 = vpack.c.bf16 %v60_v4, %v59_v3  ;;  %v62_v7 = vld [vmem:[#allocation2 + $0x18] sm:$0xff]  ;;  %s154_s15 = sshll.u32 %s256_s14, 4  ;;  %s155_s15 = int_to_ptr.vmem [resolvable:$true] %s154_s15 }
  0x16   :  { %v35_v8 = vld [vmem:[%s328_s0] sm:$0xff]  ;;  %v187_v9 = vpack.c.bf16 %v62_v7, %v61_v5  ;;  %s222_s16 = scalar_lea.vmem %s155_s15, 128  ;;  %p227_p9 = scmp.lt.s32.totalorder %s155_s15, %s155_s15 }
  0x17   :  { %39 = vperm.xlu0 %198, %v35_v8   ;;  %185 = vmatpush3.bf16.msra.mxu0 %v184_v6  ;;  %v58_v11 = vld [vmem:[%s329_s1] sm:$0xff]  ;;  %p223_p8 = scmp.ne.s32.totalorder %s155_s15, %s222_s16  ;;  %p228_p10 = scmp.lt.s32.totalorder %s222_s16, %s222_s16 }
  0x18   :  { %186 = vmatprep.subr.bf16.mxu0 %v251_v0  ;;  %v163_v13 = vld [vmem:[%s330_s2] ss:$0 sm:$0xff]  ;;  %v164_v14 = vld [vmem:[%s330_s2 + $0x1] ss:$0 sm:$0xff] }
  0x19   :  { %v166_v20 = vld [vmem:[%s332_s4] ss:$0 sm:$0xff]  ;;  %p229_p11 = por %p228_p10, %p227_p9 }
  0x1b   :  { %199 = vset.pattern.permute.xlu0 %v255_v10  ;;  %188 = vmatpush3.bf16.msra.mxu0 %v187_v9  ;;  %p230_p12 = pnand %p229_p11, %p223_p8 }
  0x1c   :  { %49 = vperm.xlu0 %199, %v35_v8  }
  0x1e   :  { %181 = vmatmul.mubr.msk.f32.vlgmr.msra.gmra.mrb[0].mxu0 %vm63_vm1, %v58_v11 }
  0x96   :  { %v40_v12 = vpop.permute.xlu0 %39 }
  0x97   :  { %v46_v16 = vmul.f32 %v163_v13, %v40_v12 }
  0x9b   :  { %v50_v15 = vpop.permute.xlu0 %49 }
  0x9c   :  { %v56_v17 = vmul.f32 %v164_v14, %v50_v15 }
  0x9e   :  { %v57_v18 = vadd.f32 %v56_v17, %v46_v16 }
  0xf1   :  { %v133_v19 = vpop.f32.mrb[0].mxu0 }
  0xf2   :  { %v137_v21 = vadd.f32 %v133_v19, %v57_v18  ;;  %v182_v22 = vpop.f32.mrb[1].mxu0 }
  0xf4   :  { %v145_v23 = vadd.f32 %v166_v20, %v137_v21 }
  0xf6   :  { %v146_v24 = vmax.f32 %v145_v23, 0.0 }
  0xf8   :  { %147 = vst.msk [vmem:[#allocation5] sm:$0xff] %vm63_vm1, %v146_v24 }
  0xf9   :  { %233 = shalt.err (!%p230_p12)
}
  0xfa   :  { %s234_s4 = scalar_lea.hbm %s333_s5, 128 }
  0xfb   :  { %p235_p13 = scmp.ne.s32.totalorder %s333_s5, %s234_s4  ;;  %p238_p0 = scmp.lt.u32.totalorder %s234_s4, %s333_s5 }
  0xfd   :  { %p240_p1 = pnand %p238_p0, %p235_p13 }
  0xff   :  { %243 = shalt.err (!%p240_p1)
}
 0x100   :  { %157 = dma.vmem_to_hbm [thread:$0]  %s155_s15, 128, %s333_s5, [#allocation4]  }
 0x101   :  { %246 = dma.done.wait [#allocation4], 128  }
 0x102   :  { %247 = vsyncadd [#allocation4], 4294967168 }
 0x103   :  { %161 = vsyncpa [#allocation3], 1 }
 0x104   :  { %162 = vsyncpa [#allocation4], 1 }

</bundles_post_ra>
